<compile_context>
chip_gen: v6e
topology: v6e:2x2x1
jax: 0.10.0
libtpu: 0.0.40
codegen_flags: <defaults>
</compile_context>

<pallas_src>
import functools

import jax
import jax.numpy as jnp
from jax.experimental import pallas as pl
from jax.experimental.pallas import tpu as pltpu

EPS = 1e-5

# Operand dtype for the two big MXU matmuls (accumulation is always f32 via
# preferred_element_type).  Set to jnp.bfloat16 for ~2-3x MXU throughput at
# production sizes; kept at f32 here so the 1e-3 check vs the f32 reference holds.
_MXU_DTYPE = jnp.float32


# --------------------------------------------------------------------------- #
# Pass 1: fused kqv projection + attention-logit / k-moment accumulation.
# --------------------------------------------------------------------------- #
def _stats_kernel(x_ref, wkqv_ref, bkqv_ref, att_ref, sk_ref, k2_ref, *, inter):
    t = pl.program_id(1)

    @pl.when(t == 0)
    def _init():
        att_ref[...] = jnp.zeros_like(att_ref)
        sk_ref[...] = jnp.zeros_like(sk_ref)
        k2_ref[...] = jnp.zeros_like(k2_ref)

    x = x_ref[...]                                                     # (P, T)
    kqv = jnp.dot(wkqv_ref[...].astype(_MXU_DTYPE), x.astype(_MXU_DTYPE),
                  preferred_element_type=jnp.float32) + bkqv_ref[...]  # (3C, T)
    k = kqv[:inter]
    q = kqv[inter:2 * inter]
    v = kqv[2 * inter:]

    # Accumulate attention logits and k moments (contract over the lane axis).
    att_ref[...] += jnp.einsum('ct,dt->cd', q, v,
                               preferred_element_type=jnp.float32)
    sk_ref[...] += jnp.sum(k, axis=1, keepdims=True)
    k2_ref[...] += jnp.einsum('ct,dt->cd', k, k,
                              preferred_element_type=jnp.float32)

    @pl.when(t == pl.num_programs(1) - 1)
    def _finalize():
        logits = att_ref[...]
        logits = logits - jnp.max(logits, axis=-1, keepdims=True)
        e = jnp.exp(logits)
        s = jnp.sum(e, axis=-1, keepdims=True)
        r = pl.reciprocal(s, approx=True)       # EUP slot instead of VALU divide
        r = r * (2.0 - s * r)                   # one Newton step -> f32-accurate
        att_ref[...] = e * r


# --------------------------------------------------------------------------- #
# Pass 2: apply the fully-folded per-batch affine map + residual ReLU.
# --------------------------------------------------------------------------- #
def _apply_kernel(x_ref, f_ref, h_ref, o_ref):
    x = x_ref[...]                                                     # (P, T)
    z = jnp.dot(f_ref[...].astype(_MXU_DTYPE), x.astype(_MXU_DTYPE),
                preferred_element_type=jnp.float32)
    o_ref[...] = jnp.maximum(z + h_ref[...] + x, 0.0)


def _pick_tile(p, n):
    # Biggest lane tile that divides N and keeps the per-buffer footprint small.
    budget = 4 << 20
    for t in (2048, 1024, 512, 256, 128):
        if n % t == 0 and p * t * 4 <= budget:
            return t
    # TODO(synk): N not a multiple of 128 falls back to one full-width tile
    # (masked stores); a padded+masked stats variant would be needed to tile it.
    return n


def _vmem_limit(block_bytes):
    # ~2x for double-buffering plus headroom; stay below v7x's 64 MiB physical VMEM.
    return int(min(max(2 * block_bytes + (8 << 20), 32 << 20), 60 << 20))


def make_params(key, plane):
    inter = plane // 2
    ks = jax.random.split(key, 12)

    def nrm(k, shape, scale=0.1):
        return scale * jax.random.normal(k, shape, dtype=jnp.float32)

    return dict(
        wk=nrm(ks[0], (inter, plane)), bk=nrm(ks[1], (inter, 1)),
        wq=nrm(ks[2], (inter, plane)), bq=nrm(ks[3], (inter, 1)),
        wv=nrm(ks[4], (inter, plane)), bv=nrm(ks[5], (inter, 1)),
        wwg=nrm(ks[6], (inter, inter)),
        g1=1.0 + nrm(ks[7], (inter, 1)), be1=nrm(ks[8], (inter, 1)),
        wout=nrm(ks[9], (plane, inter)), bout=nrm(ks[10], (plane, 1)),
        g2=1.0 + nrm(ks[11], (plane, 1)), be2=jnp.zeros((plane, 1), jnp.float32),
    )


@jax.jit
def spatial_gcn(x, params):
    b, p, h, w, d = x.shape
    n = h * w * d
    c = params['wk'].shape[0]                       # inter_plane = plane // 2
    x2 = x.reshape(b, p, n).astype(jnp.float32)

    t = _pick_tile(p, n)
    nt = n // t
    hp = jax.lax.Precision.HIGHEST

    # Stacked k/q/v projection (one matmul instead of three).
    wkqv = jnp.concatenate([params['wk'], params['wq'], params['wv']], axis=0)
    bkqv = jnp.concatenate([params['bk'], params['bq'], params['bv']], axis=0)

    # ---- pass 1: attention + k moments, tiled over N -----------------------
    blk1 = 4 * (p * t + 3 * c * p + 3 * c + 2 * c * c + c)
    att, sk, k2 = pl.pallas_call(
        functools.partial(_stats_kernel, inter=c),
        grid=(b, nt),
        in_specs=[
            pl.BlockSpec((None, p, t), lambda bi, ti: (bi, 0, ti)),
            pl.BlockSpec((3 * c, p), lambda bi, ti: (0, 0)),
            pl.BlockSpec((3 * c, 1), lambda bi, ti: (0, 0)),
        ],
        out_specs=(
            pl.BlockSpec((None, c, c), lambda bi, ti: (bi, 0, 0)),
            pl.BlockSpec((None, c, 1), lambda bi, ti: (bi, 0, 0)),
            pl.BlockSpec((None, c, c), lambda bi, ti: (bi, 0, 0)),
        ),
        out_shape=(
            jax.ShapeDtypeStruct((b, c, c), jnp.float32),   # softmax(q v^T)
            jax.ShapeDtypeStruct((b, c, 1), jnp.float32),   # sum_n k
            jax.ShapeDtypeStruct((b, c, c), jnp.float32),   # sum_n k k^T
        ),
        compiler_params=pltpu.CompilerParams(
            dimension_semantics=("parallel", "arbitrary"),
            vmem_limit_bytes=_vmem_limit(blk1)),
    )(x2, wkqv, bkqv)

    # ---- tiny parameter-sized algebra: fold conv_wg + bn_wg + out-conv +
    # ContBatchNorm3d into one per-batch (plane, plane) matrix + bias ---------
    denom = float(b * n)
    wwg, wout, wk, bk = params['wwg'], params['wout'], params['wk'], params['bk']
    g1, be1, bout = params['g1'], params['be1'], params['bout']
    g2, be2 = params['g2'], params['be2']

    A = jnp.einsum('oc,bic->boi', wwg, att, precision=hp)        # conv_wg @ att^T
    mu1 = jnp.einsum('boi,bix->ox', A, sk, precision=hp) / denom           # E[avw]
    euu = jnp.einsum('boi,bij,bpj->op', A, k2, A, precision=hp) / denom    # E[avw avw^T]
    var1 = jnp.diagonal(euu)[:, None] - mu1 ** 2                           # biased var
    a1 = g1 * jax.lax.rsqrt(var1 + EPS)
    w1 = wout * a1.T                                             # bn_wg folded into out-conv
    c1 = bout + jnp.einsum('pc,cx->px', wout, be1 - a1 * mu1, precision=hp)
    mu2 = jnp.einsum('pc,cx->px', w1, mu1, precision=hp) + c1              # E[z]
    cov = euu - mu1 * mu1.T
    var2 = jnp.einsum('pc,cd,pd->p', w1, cov, w1, precision=hp)[:, None]   # Var[z]
    a2 = g2 * jax.lax.rsqrt(var2 + EPS)
    w2 = w1 * a2                                                 # ContBatchNorm3d folded
    c2 = a2 * (c1 - mu2) + be2
    g_b = jnp.einsum('pc,bci->bpi', w2, A, precision=hp)                   # (B,P,C)
    fused_w = jnp.einsum('bpc,cq->bpq', g_b, wk, precision=hp)             # (B,P,P)
    fused_b = jnp.einsum('bpc,cx->bpx', g_b, bk, precision=hp) + c2        # (B,P,1)

    # ---- pass 2: single folded matmul + residual ReLU, tiled over N --------
    blk2 = 4 * (2 * p * t + p * p + p)
    out = pl.pallas_call(
        _apply_kernel,
        grid=(b, nt),
        in_specs=[
            pl.BlockSpec((None, p, t), lambda bi, ti: (bi, 0, ti)),
            pl.BlockSpec((None, p, p), lambda bi, ti: (bi, 0, 0)),
            pl.BlockSpec((None, p, 1), lambda bi, ti: (bi, 0, 0)),
        ],
        out_specs=pl.BlockSpec((None, p, t), lambda bi, ti: (bi, 0, ti)),
        out_shape=jax.ShapeDtypeStruct((b, p, n), jnp.float32),
        compiler_params=pltpu.CompilerParams(
            dimension_semantics=("parallel", "parallel"),
            vmem_limit_bytes=_vmem_limit(blk2)),
    )(x2, fused_w, fused_b)
    return out.reshape(b, p, h, w, d)


def spatial_gcn_ref(x, params):
    # Pure-JAX reference mirroring the PyTorch forward (training-mode BN).
    hp = jax.lax.Precision.HIGHEST
    b, p, h, w, d = x.shape
    n = h * w * d
    x2 = x.reshape(b, p, n)
    k = jnp.einsum('cp,bpn->bcn', params['wk'], x2, precision=hp) + params['bk']
    q = jnp.einsum('cp,bpn->bcn', params['wq'], x2, precision=hp) + params['bq']
    v = jnp.einsum('cp,bpn->bcn', params['wv'], x2, precision=hp) + params['bv']
    att = jnp.einsum('bcn,bdn->bcd', q, v, precision=hp)
    att = jax.nn.softmax(att, axis=-1)
    av = jnp.einsum('bij,bin->bjn', att, k, precision=hp)
    avw = jnp.einsum('oc,bcn->bon', params['wwg'], av, precision=hp)

    def bn(t, g, bb):
        mu = jnp.mean(t, axis=(0, 2), keepdims=True)
        var = jnp.mean((t - mu) ** 2, axis=(0, 2), keepdims=True)
        return (t - mu) * jax.lax.rsqrt(var + EPS) * g + bb

    y1 = bn(avw, params['g1'], params['be1'])
    z = jnp.einsum('pc,bcn->bpn', params['wout'], y1, precision=hp) + params['bout']
    z = bn(z, params['g2'], params['be2'])
    out = jnp.maximum(z + x2, 0.0)
    return out.reshape(b, p, h, w, d)


if __name__ == "__main__":
    key = jax.random.PRNGKey(0)
    kx, kp = jax.random.split(key)
    # plane=16 -> inter=8 (full f32 sublanes); N = 4*8*8 = 256 -> two 128-lane tiles.
    B, PLANE, H, W, D = 2, 16, 4, 8, 8
    x = jax.random.normal(kx, (B, PLANE, H, W, D), dtype=jnp.float32)
    params = make_params(kp, PLANE)

    out = spatial_gcn(x, params)
    jax.block_until_ready(out)

    ref = spatial_gcn_ref(x, params)
    assert out.shape == x.shape
    max_err = float(jnp.max(jnp.abs(out - ref)))
    assert bool(jnp.allclose(out, ref, rtol=1e-3, atol=1e-3)), f"max err {max_err}"
    print("KERNEL_OK")
</pallas_src>

<mosaic_0001>
module attributes {stable_mosaic.version = 11 : i64} {
  func.func @_stats_kernel(%arg0: i32, %arg1: i32, %arg2: memref<1x16x256xf32, #tpu.memory_space<vmem>>, %arg3: memref<24x16xf32, #tpu.memory_space<vmem>>, %arg4: memref<24x1xf32, #tpu.memory_space<vmem>>, %arg5: memref<1x8x8xf32, #tpu.memory_space<vmem>>, %arg6: memref<1x8x1xf32, #tpu.memory_space<vmem>>, %arg7: memref<1x8x8xf32, #tpu.memory_space<vmem>>) attributes {dimension_semantics = [#tpu.dimension_semantics<parallel>, #tpu.dimension_semantics<arbitrary>], iteration_bounds = array<i64: 2, 1>, scalar_prefetch = 0 : i64, scratch_operands = 0 : i64, tpu.core_type = #tpu.core_type<tc>, window_params = [{transform_indices = @transform_0, window_bounds = array<i64: 1, 16, 256>}, {pipeline_mode = #tpu.pipeline_mode<synchronous>, transform_indices = @transform_1, window_bounds = array<i64: 24, 16>}, {pipeline_mode = #tpu.pipeline_mode<synchronous>, transform_indices = @transform_2, window_bounds = array<i64: 24, 1>}, {transform_indices = @transform_3, window_bounds = array<i64: 1, 8, 8>}, {transform_indices = @transform_4, window_bounds = array<i64: 1, 8, 1>}, {transform_indices = @transform_5, window_bounds = array<i64: 1, 8, 8>}]} {
    %c0_i32 = arith.constant 0 : i32
    %0 = arith.cmpi eq, %arg1, %c0_i32 : i32
    %1 = arith.extui %0 : i1 to i32
    %c0_i32_0 = arith.constant 0 : i32
    %2 = arith.cmpi ne, %1, %c0_i32_0 : i32
    scf.if %2 {
      %cst_30 = arith.constant 0.000000e+00 : f32
      %38 = vector.broadcast %cst_30 : f32 to vector<8x8xf32>
      %c0_31 = arith.constant 0 : index
      %c0_32 = arith.constant 0 : index
      %c0_33 = arith.constant 0 : index
      %39 = vector.load %arg5[%c0_31, %c0_32, %c0_33] : memref<1x8x8xf32, #tpu.memory_space<vmem>>, vector<1x8x8xf32>
      %40 = vector.shape_cast %39 : vector<1x8x8xf32> to vector<8x8xf32>
      %41 = vector.shape_cast %38 : vector<8x8xf32> to vector<1x8x8xf32>
      tpu.vector_store %arg5[%c0_31, %c0_32, %c0_33], %41 {strides = array<i32>} : memref<1x8x8xf32, #tpu.memory_space<vmem>>, vector<1x8x8xf32>,
      %cst_34 = arith.constant 0.000000e+00 : f32
      %42 = vector.broadcast %cst_34 : f32 to vector<8x1xf32>
      %c0_35 = arith.constant 0 : index
      %c0_36 = arith.constant 0 : index
      %c0_37 = arith.constant 0 : index
      %43 = vector.load %arg6[%c0_35, %c0_36, %c0_37] : memref<1x8x1xf32, #tpu.memory_space<vmem>>, vector<1x8x1xf32>
      %44 = vector.shape_cast %43 : vector<1x8x1xf32> to vector<8x1xf32>
      %45 = vector.shape_cast %42 : vector<8x1xf32> to vector<1x8x1xf32>
      tpu.vector_store %arg6[%c0_35, %c0_36, %c0_37], %45 {strides = array<i32>} : memref<1x8x1xf32, #tpu.memory_space<vmem>>, vector<1x8x1xf32>,
      %cst_38 = arith.constant 0.000000e+00 : f32
      %46 = vector.broadcast %cst_38 : f32 to vector<8x8xf32>
      %c0_39 = arith.constant 0 : index
      %c0_40 = arith.constant 0 : index
      %c0_41 = arith.constant 0 : index
      %47 = vector.load %arg7[%c0_39, %c0_40, %c0_41] : memref<1x8x8xf32, #tpu.memory_space<vmem>>, vector<1x8x8xf32>
      %48 = vector.shape_cast %47 : vector<1x8x8xf32> to vector<8x8xf32>
      %49 = vector.shape_cast %46 : vector<8x8xf32> to vector<1x8x8xf32>
      tpu.vector_store %arg7[%c0_39, %c0_40, %c0_41], %49 {strides = array<i32>} : memref<1x8x8xf32, #tpu.memory_space<vmem>>, vector<1x8x8xf32>,
    } else {
    }
    %c0 = arith.constant 0 : index
    %c0_1 = arith.constant 0 : index
    %c0_2 = arith.constant 0 : index
    %3 = vector.load %arg2[%c0, %c0_1, %c0_2] : memref<1x16x256xf32, #tpu.memory_space<vmem>>, vector<1x16x256xf32>
    %4 = vector.shape_cast %3 : vector<1x16x256xf32> to vector<16x256xf32>
    %c0_3 = arith.constant 0 : index
    %c0_4 = arith.constant 0 : index
    %5 = vector.load %arg3[%c0_3, %c0_4] : memref<24x16xf32, #tpu.memory_space<vmem>>, vector<24x16xf32>
    %cst = arith.constant dense<0.000000e+00> : vector<24x256xf32>
    %6 = tpu.matmul %5, %4, %cst {dimension_numbers = #tpu.dot_dimension_numbers<[1], [0], [0], [1], [0, 0, 1, 1], [], []>} : vector<24x16xf32>, vector<16x256xf32>, vector<24x256xf32> -> vector<24x256xf32>
    %c0_5 = arith.constant 0 : index
    %c0_6 = arith.constant 0 : index
    %7 = vector.load %arg4[%c0_5, %c0_6] : memref<24x1xf32, #tpu.memory_space<vmem>>, vector<24x1xf32>
    %8 = vector.broadcast %7 : vector<24x1xf32> to vector<24x256xf32>
    %9 = arith.addf %6, %8 : vector<24x256xf32>
    %10 = vector.extract_strided_slice %9 {offsets = [0, 0], sizes = [8, 256], strides = [1, 1]} : vector<24x256xf32> to vector<8x256xf32>
    %11 = vector.extract_strided_slice %9 {offsets = [8, 0], sizes = [8, 256], strides = [1, 1]} : vector<24x256xf32> to vector<8x256xf32>
    %12 = vector.extract_strided_slice %9 {offsets = [16, 0], sizes = [8, 256], strides = [1, 1]} : vector<24x256xf32> to vector<8x256xf32>
    %c0_7 = arith.constant 0 : index
    %c0_8 = arith.constant 0 : index
    %c0_9 = arith.constant 0 : index
    %13 = vector.load %arg5[%c0_7, %c0_8, %c0_9] : memref<1x8x8xf32, #tpu.memory_space<vmem>>, vector<1x8x8xf32>
    %14 = vector.shape_cast %13 : vector<1x8x8xf32> to vector<8x8xf32>
    "tpu.trace_start"() <{level = 10 : i32, message = "ct,dt->cd"}> : () -> ()
    %cst_10 = arith.constant dense<0.000000e+00> : vector<8x8xf32>
    %15 = tpu.matmul %11, %12, %cst_10 {dimension_numbers = #tpu.dot_dimension_numbers<[1], [1], [0], [0], [0, 0, 1, 0], [], []>} : vector<8x256xf32>, vector<8x256xf32>, vector<8x8xf32> -> vector<8x8xf32>
    "tpu.trace_stop"() : () -> ()
    %16 = arith.addf %14, %15 : vector<8x8xf32>
    %c0_11 = arith.constant 0 : index
    %c0_12 = arith.constant 0 : index
    %c0_13 = arith.constant 0 : index
    %17 = vector.load %arg5[%c0_11, %c0_12, %c0_13] : memref<1x8x8xf32, #tpu.memory_space<vmem>>, vector<1x8x8xf32>
    %18 = vector.shape_cast %17 : vector<1x8x8xf32> to vector<8x8xf32>
    %19 = vector.shape_cast %16 : vector<8x8xf32> to vector<1x8x8xf32>
    tpu.vector_store %arg5[%c0_11, %c0_12, %c0_13], %19 {strides = array<i32>} : memref<1x8x8xf32, #tpu.memory_space<vmem>>, vector<1x8x8xf32>,
    %c0_14 = arith.constant 0 : index
    %c0_15 = arith.constant 0 : index
    %c0_16 = arith.constant 0 : index
    %20 = vector.load %arg6[%c0_14, %c0_15, %c0_16] : memref<1x8x1xf32, #tpu.memory_space<vmem>>, vector<1x8x1xf32>
    %21 = vector.shape_cast %20 : vector<1x8x1xf32> to vector<8x1xf32>
    %cst_17 = arith.constant dense<0.000000e+00> : vector<8xf32>
    %22 = vector.multi_reduction <add>, %10, %cst_17 [1] : vector<8x256xf32> to vector<8xf32>
    %23 = vector.shape_cast %22 : vector<8xf32> to vector<8x1xf32>
    %24 = arith.addf %21, %23 : vector<8x1xf32>
    %c0_18 = arith.constant 0 : index
    %c0_19 = arith.constant 0 : index
    %c0_20 = arith.constant 0 : index
    %25 = vector.load %arg6[%c0_18, %c0_19, %c0_20] : memref<1x8x1xf32, #tpu.memory_space<vmem>>, vector<1x8x1xf32>
    %26 = vector.shape_cast %25 : vector<1x8x1xf32> to vector<8x1xf32>
    %27 = vector.shape_cast %24 : vector<8x1xf32> to vector<1x8x1xf32>
    tpu.vector_store %arg6[%c0_18, %c0_19, %c0_20], %27 {strides = array<i32>} : memref<1x8x1xf32, #tpu.memory_space<vmem>>, vector<1x8x1xf32>,
    %c0_21 = arith.constant 0 : index
    %c0_22 = arith.constant 0 : index
    %c0_23 = arith.constant 0 : index
    %28 = vector.load %arg7[%c0_21, %c0_22, %c0_23] : memref<1x8x8xf32, #tpu.memory_space<vmem>>, vector<1x8x8xf32>
    %29 = vector.shape_cast %28 : vector<1x8x8xf32> to vector<8x8xf32>
    "tpu.trace_start"() <{level = 10 : i32, message = "ct,dt->cd"}> : () -> ()
    %cst_24 = arith.constant dense<0.000000e+00> : vector<8x8xf32>
    %30 = tpu.matmul %10, %10, %cst_24 {dimension_numbers = #tpu.dot_dimension_numbers<[1], [1], [0], [0], [0, 0, 1, 0], [], []>} : vector<8x256xf32>, vector<8x256xf32>, vector<8x8xf32> -> vector<8x8xf32>
    "tpu.trace_stop"() : () -> ()
    %31 = arith.addf %29, %30 : vector<8x8xf32>
    %c0_25 = arith.constant 0 : index
    %c0_26 = arith.constant 0 : index
    %c0_27 = arith.constant 0 : index
    %32 = vector.load %arg7[%c0_25, %c0_26, %c0_27] : memref<1x8x8xf32, #tpu.memory_space<vmem>>, vector<1x8x8xf32>
    %33 = vector.shape_cast %32 : vector<1x8x8xf32> to vector<8x8xf32>
    %34 = vector.shape_cast %31 : vector<8x8xf32> to vector<1x8x8xf32>
    tpu.vector_store %arg7[%c0_25, %c0_26, %c0_27], %34 {strides = array<i32>} : memref<1x8x8xf32, #tpu.memory_space<vmem>>, vector<1x8x8xf32>,
    %c0_i32_28 = arith.constant 0 : i32
    %35 = arith.cmpi eq, %arg1, %c0_i32_28 : i32
    %36 = arith.extui %35 : i1 to i32
    %c0_i32_29 = arith.constant 0 : i32
    %37 = arith.cmpi ne, %36, %c0_i32_29 : i32
    scf.if %37 {
      %c0_30 = arith.constant 0 : index
      %c0_31 = arith.constant 0 : index
      %c0_32 = arith.constant 0 : index
      %38 = vector.load %arg5[%c0_30, %c0_31, %c0_32] : memref<1x8x8xf32, #tpu.memory_space<vmem>>, vector<1x8x8xf32>
      %39 = vector.shape_cast %38 : vector<1x8x8xf32> to vector<8x8xf32>
      %cst_33 = arith.constant dense<0xFF800000> : vector<8xf32>
      %40 = vector.multi_reduction <maximumf>, %39, %cst_33 [1] : vector<8x8xf32> to vector<8xf32>
      %41 = vector.shape_cast %40 : vector<8xf32> to vector<8x1xf32>
      %42 = vector.broadcast %41 : vector<8x1xf32> to vector<8x8xf32>
      %43 = arith.subf %39, %42 : vector<8x8xf32>
      %44 = math.exp %43 : vector<8x8xf32>
      %cst_34 = arith.constant dense<0.000000e+00> : vector<8xf32>
      %45 = vector.multi_reduction <add>, %44, %cst_34 [1] : vector<8x8xf32> to vector<8xf32>
      %46 = vector.shape_cast %45 : vector<8xf32> to vector<8x1xf32>
      %47 = tpu.reciprocal %46 {approx = true} : vector<8x1xf32> -> vector<8x1xf32>
      %48 = arith.mulf %46, %47 : vector<8x1xf32>
      %cst_35 = arith.constant 2.000000e+00 : f32
      %49 = vector.broadcast %cst_35 : f32 to vector<8x1xf32>
      %50 = arith.subf %49, %48 : vector<8x1xf32>
      %51 = arith.mulf %47, %50 : vector<8x1xf32>
      %52 = vector.broadcast %51 : vector<8x1xf32> to vector<8x8xf32>
      %53 = arith.mulf %44, %52 : vector<8x8xf32>
      %c0_36 = arith.constant 0 : index
      %c0_37 = arith.constant 0 : index
      %c0_38 = arith.constant 0 : index
      %54 = vector.load %arg5[%c0_36, %c0_37, %c0_38] : memref<1x8x8xf32, #tpu.memory_space<vmem>>, vector<1x8x8xf32>
      %55 = vector.shape_cast %54 : vector<1x8x8xf32> to vector<8x8xf32>
      %56 = vector.shape_cast %53 : vector<8x8xf32> to vector<1x8x8xf32>
      tpu.vector_store %arg5[%c0_36, %c0_37, %c0_38], %56 {strides = array<i32>} : memref<1x8x8xf32, #tpu.memory_space<vmem>>, vector<1x8x8xf32>,
    } else {
    }
    return
  }
  func.func @transform_0(%arg0: i32, %arg1: i32) -> (i32, i32, i32) {
    %c0_i32 = arith.constant 0 : i32
    %c0_i32_0 = arith.constant 0 : i32
    return %arg0, %c0_i32, %arg1 : i32, i32, i32
  }
  func.func @transform_1(%arg0: i32, %arg1: i32) -> (i32, i32) {
    %c0_i32 = arith.constant 0 : i32
    %c0_i32_0 = arith.constant 0 : i32
    %c0_i32_1 = arith.constant 0 : i32
    return %c0_i32, %c0_i32_0 : i32, i32
  }
  func.func @transform_2(%arg0: i32, %arg1: i32) -> (i32, i32) {
    %c0_i32 = arith.constant 0 : i32
    %c0_i32_0 = arith.constant 0 : i32
    %c0_i32_1 = arith.constant 0 : i32
    return %c0_i32, %c0_i32_0 : i32, i32
  }
  func.func @transform_3(%arg0: i32, %arg1: i32) -> (i32, i32, i32) {
    %c0_i32 = arith.constant 0 : i32
    %c0_i32_0 = arith.constant 0 : i32
    %c0_i32_1 = arith.constant 0 : i32
    return %arg0, %c0_i32, %c0_i32_0 : i32, i32, i32
  }
  func.func @transform_4(%arg0: i32, %arg1: i32) -> (i32, i32, i32) {
    %c0_i32 = arith.constant 0 : i32
    %c0_i32_0 = arith.constant 0 : i32
    %c0_i32_1 = arith.constant 0 : i32
    return %arg0, %c0_i32, %c0_i32_0 : i32, i32, i32
  }
  func.func @transform_5(%arg0: i32, %arg1: i32) -> (i32, i32, i32) {
    %c0_i32 = arith.constant 0 : i32
    %c0_i32_0 = arith.constant 0 : i32
    %c0_i32_1 = arith.constant 0 : i32
    return %arg0, %c0_i32, %c0_i32_0 : i32, i32, i32
  }
}

module attributes {stable_mosaic.version = 11 : i64} {
  func.func @_apply_kernel(%arg0: i32, %arg1: i32, %arg2: memref<1x16x256xf32, #tpu.memory_space<vmem>>, %arg3: memref<1x16x16xf32, #tpu.memory_space<vmem>>, %arg4: memref<1x16x1xf32, #tpu.memory_space<vmem>>, %arg5: memref<1x16x256xf32, #tpu.memory_space<vmem>>) attributes {dimension_semantics = [#tpu.dimension_semantics<parallel>, #tpu.dimension_semantics<parallel>], iteration_bounds = array<i64: 2, 1>, scalar_prefetch = 0 : i64, scratch_operands = 0 : i64, tpu.core_type = #tpu.core_type<tc>, window_params = [{transform_indices = @transform_0, window_bounds = array<i64: 1, 16, 256>}, {transform_indices = @transform_1, window_bounds = array<i64: 1, 16, 16>}, {transform_indices = @transform_2, window_bounds = array<i64: 1, 16, 1>}, {transform_indices = @transform_3, window_bounds = array<i64: 1, 16, 256>}]} {
    %c0 = arith.constant 0 : index
    %c0_0 = arith.constant 0 : index
    %c0_1 = arith.constant 0 : index
    %0 = vector.load %arg2[%c0, %c0_0, %c0_1] : memref<1x16x256xf32, #tpu.memory_space<vmem>>, vector<1x16x256xf32>
    %1 = vector.shape_cast %0 : vector<1x16x256xf32> to vector<16x256xf32>
    %c0_2 = arith.constant 0 : index
    %c0_3 = arith.constant 0 : index
    %c0_4 = arith.constant 0 : index
    %2 = vector.load %arg3[%c0_2, %c0_3, %c0_4] : memref<1x16x16xf32, #tpu.memory_space<vmem>>, vector<1x16x16xf32>
    %3 = vector.shape_cast %2 : vector<1x16x16xf32> to vector<16x16xf32>
    %cst = arith.constant dense<0.000000e+00> : vector<16x256xf32>
    %4 = tpu.matmul %3, %1, %cst {dimension_numbers = #tpu.dot_dimension_numbers<[1], [0], [0], [1], [0, 0, 1, 1], [], []>} : vector<16x16xf32>, vector<16x256xf32>, vector<16x256xf32> -> vector<16x256xf32>
    %c0_5 = arith.constant 0 : index
    %c0_6 = arith.constant 0 : index
    %c0_7 = arith.constant 0 : index
    %5 = vector.load %arg4[%c0_5, %c0_6, %c0_7] : memref<1x16x1xf32, #tpu.memory_space<vmem>>, vector<1x16x1xf32>
    %6 = vector.shape_cast %5 : vector<1x16x1xf32> to vector<16x1xf32>
    %7 = vector.broadcast %6 : vector<16x1xf32> to vector<16x256xf32>
    %8 = arith.addf %4, %7 : vector<16x256xf32>
    %9 = arith.addf %8, %1 : vector<16x256xf32>
    %cst_8 = arith.constant 0.000000e+00 : f32
    %10 = vector.broadcast %cst_8 : f32 to vector<16x256xf32>
    %11 = arith.maximumf %9, %10 : vector<16x256xf32>
    %c0_9 = arith.constant 0 : index
    %c0_10 = arith.constant 0 : index
    %c0_11 = arith.constant 0 : index
    %12 = vector.load %arg5[%c0_9, %c0_10, %c0_11] : memref<1x16x256xf32, #tpu.memory_space<vmem>>, vector<1x16x256xf32>
    %13 = vector.shape_cast %12 : vector<1x16x256xf32> to vector<16x256xf32>
    %14 = vector.shape_cast %11 : vector<16x256xf32> to vector<1x16x256xf32>
    tpu.vector_store %arg5[%c0_9, %c0_10, %c0_11], %14 {strides = array<i32>} : memref<1x16x256xf32, #tpu.memory_space<vmem>>, vector<1x16x256xf32>,
    return
  }
  func.func @transform_0(%arg0: i32, %arg1: i32) -> (i32, i32, i32) {
    %c0_i32 = arith.constant 0 : i32
    %c0_i32_0 = arith.constant 0 : i32
    return %arg0, %c0_i32, %arg1 : i32, i32, i32
  }
  func.func @transform_1(%arg0: i32, %arg1: i32) -> (i32, i32, i32) {
    %c0_i32 = arith.constant 0 : i32
    %c0_i32_0 = arith.constant 0 : i32
    %c0_i32_1 = arith.constant 0 : i32
    return %arg0, %c0_i32, %c0_i32_0 : i32, i32, i32
  }
  func.func @transform_2(%arg0: i32, %arg1: i32) -> (i32, i32, i32) {
    %c0_i32 = arith.constant 0 : i32
    %c0_i32_0 = arith.constant 0 : i32
    %c0_i32_1 = arith.constant 0 : i32
    return %arg0, %c0_i32, %c0_i32_0 : i32, i32, i32
  }
  func.func @transform_3(%arg0: i32, %arg1: i32) -> (i32, i32, i32) {
    %c0_i32 = arith.constant 0 : i32
    %c0_i32_0 = arith.constant 0 : i32
    return %arg0, %c0_i32, %arg1 : i32, i32, i32
  }
}

</mosaic_0001>

<bundles_post_ra>
// kernel: spatial_gcn.2
= control target key start
LH: loop header
LB: loop body
LE: loop exit
PB: predicated region body
PF: predicated region fallthrough
CT: control target
= control target key end

     0   :  { %s805_s18 = smov 0   ;;  %s807_s19 = smov 0   ;;  %s887_s0 = inlined_call_operand.vmem [shape: f32[2,16,256], index: 0, kind: input, shape index: {}]   ;;  %s888_s1 = inlined_call_operand.vmem [shape: f32[24,16], index: 1, kind: input, shape index: {}]   ;;  %s889_s2 = inlined_call_operand.vmem [shape: f32[24,1], index: 2, kind: input, shape index: {}]   ;;  %s890_s3 = inlined_call_operand.vmem [shape: f32[2,8,8], index: 3, kind: output, shape index: {0}]   ;;  %s891_s4 = inlined_call_operand.vmem [shape: f32[2,8,1], index: 4, kind: output, shape index: {1}]   ;;  %s892_s5 = inlined_call_operand.vmem [shape: f32[2,8,8], index: 5, kind: output, shape index: {2}]  }
   0x1   :  { %s809_s20 = smov 0  }
   0x2 LB: > { %s28_s21 = sadd.s32 1, %s767_s19  ;;  %p705_p0 = scmp.ge.s32.totalorder %s771_s20, 1  ;;  %s771_s20 = sphi %s809_s20, %s16_s20   ;;  %s767_s19 = sphi %s807_s19, %s894_s19   ;;  %s763_s18 = sphi %s805_s18, %s893_s18  }
   0x3   : > { %p30_p1 = scmp.ge.s32.totalorder %s28_s21, 2  ;;  %p211_p2 = scmp.lt.s32.totalorder %s771_s20, 3 }
   0x5   : > { %s896_s21 = smov (%p30_p1, %s28_s21), 0  ;;  %p212_p3 = pnand %p705_p0, %p211_p2 }
   0x6   : > { %p251_p4 = scmp.lt.s32.totalorder (!%p212_p3), %s763_s18, 1 }
   0x7   : > { %215 = sbr.rel (%p212_p3) target bundleno = 751 (0x2ef), region = 32 }
   0xc   : > { %v773_v0 = vmov 0.0   ;;  %v290_v1 = vld [vmem:[%s889_s2 + $0x10] sm:$0xff]  ;;  %v288_v2 = vld [vmem:[%s889_s2] sm:$0xff]  ;;  %s898_s18 = smov (!%p251_p4, %s763_s18), 1  ;;  %v774_v3 = vmov 0   ;;  %v289_v4 = vld [vmem:[%s889_s2 + $0x8] sm:$0xff] }
   0xd   : > { %380 = vmatprep.mubr.f32.mxu0 %v773_v0  ;;  %744 = vset.pattern.permute.xlu1 %v774_v3  ;;  %s716_s26 = sshll.u32 %s898_s18, 5  ;;  %v285_v9 = vld [vmem:[%s888_s1] sm:$0xff]  ;;  %vm306_vm0 = vcmask 130048   ;;  %v286_v10 = vld [vmem:[%s888_s1 + $0x8] sm:$0xff]  ;;  %v287_v11 = vld [vmem:[%s888_s1 + $0x10] sm:$0xff]  ;;  %s847_s13 = sshll.u32 %s898_s18, 3 }
   0xe   : > { %743 = vset.pattern.permute.xlu0 %v774_v3  ;;  %293 = vperm.xlu1 %744, %v288_v2   ;;  %s258_s6 = scalar_lea.vmem %s887_s0, %s716_s26  ;;  %vm276_vm1 = vcmask 64512   ;;  %s853_s16 = scalar_lea.vmem %s890_s3, %s847_s13  ;;  %vm278_vm2 = vcmask 7168  }
   0xf   : > { %303 = vperm.xlu0 %743, %v290_v1   ;;  %v284_v5 = vld [vmem:[%s258_s6 + $0x18] sm:$0xff]  ;;  %v283_v6 = vld [vmem:[%s258_s6 + $0x10] sm:$0xff]  ;;  %v282_v7 = vld [vmem:[%s258_s6 + $0x8] sm:$0xff]  ;;  %277 = vst.msk [vmem:[%s853_s16] sm:$0xff] %vm276_vm1, %v773_v0  ;;  %s271_s22 = scalar_lea.vmem %s892_s5, %s847_s13  ;;  %s267_s25 = scalar_lea.vmem %s891_s4, %s847_s13 }
  0x10   : > { %344 = vmatprep.subr.mxu0 %v284_v5  ;;  %v281_v8 = vld [vmem:[%s258_s6] sm:$0xff]  ;;  %280 = vst.msk [vmem:[%s271_s22] sm:$0xff] %vm276_vm1, %v773_v0 }
  0x11   : > { %345 = vmatpush1.msra.mxu0 %v283_v6  ;;  %279 = vst.msk [vmem:[%s267_s25] sm:$0xff] %vm278_vm2, %v773_v0 }
  0x12   : > { %346 = vmatprep.subr.mxu0 %v282_v7 }
  0x13   : > { %298 = vperm.xlu0 %743, %v289_v4   ;;  %347 = vmatpush1.msra.mxu0 %v281_v8 }
  0x14   : > { %711 = vmatmul.mubr.msk.f32.vlgmr.msra.gmra.mxu0 %vm306_vm0, %v285_v9 }
  0x15   : > { %386 = vmatprep.mubr.f32.mxu0 %v773_v0 }
  0x16   : > { %v399_v28 = vld [vmem:[%s853_s16] sm:$0xff] }
  0x17   : > { %v480_v32 = vld [vmem:[%s271_s22] sm:$0xff] }
  0x18   : > { %712 = vmatmul.mubr.msk.f32.gmra.mxu0 %vm306_vm0, %v286_v10  ;;  %v473_v44 = vld [vmem:[%s267_s25] sm:$0xff] }
  0x19   : > { %392 = vmatprep.mubr.f32.mxu0 %v773_v0 }
  0x1c   : > { %713 = vmatmul.mubr.msk.f32.gmra.mxu0 %vm306_vm0, %v287_v11 }
  0x89   : > { %v294_v13 = vpop.permute.xlu1 %293 }
  0x8a   : > { %v304_v12 = vpop.permute.xlu0 %303 }
  0x8e   : > { %v299_v20 = vpop.permute.xlu0 %298 }
  0xd4   : > { %v382_v14 = vpop.f32.mrf.mxu0 }
  0xd5   : > { %v383_v16 = vadd.f32 %v382_v14, %v294_v13 }
  0xd6   : > { %v384_v15 = vpop.f32.mrf.mxu0 }
  0xd7   : > { %v385_v17 = vadd.f32 %v384_v15, %v294_v13 }
  0xd8   : > { %v388_v18 = vpop.f32.mrf.mxu0 }
  0xd9   : > { %v474_v19 = vadd.f32 %v385_v17, %v383_v16  ;;  %v389_v27 = vadd.f32 %v388_v18, %v299_v20 }
  0xda   : > { %v390_v21 = vpop.f32.mrf.mxu0 }
  0xdb   : > { %v391_v22 = vadd.f32 %v390_v21, %v299_v20 }
  0xdc   : > { %v394_v23 = vpop.f32.mrf.mxu0 }
  0xdd   : > { %464 = vmatprep.mubr.f32.mxu1 %v391_v22  ;;  %v395_v26 = vadd.f32 %v394_v23, %v304_v12 }
  0xde   : > { %v396_v24 = vpop.f32.mrf.mxu0 }
  0xdf   : > { %v397_v25 = vadd.f32 %v396_v24, %v304_v12 }
  0xe1   : > { %430 = vmatprep.subr.mxu1 %v397_v25 }
  0xe2   : > { %431 = vmatpush1.xpose.msra.mxu1 %v395_v26 }
  0xe3   : > { %511 = vmatprep.subr.mxu1 %v385_v17 }
  0xe5   : > { %465 = vmatmul.mubr.f32.vlgmr.msra.gmra.mxu1 %v389_v27 }
  0xe6   : > { %512 = vmatpush1.xpose.msra.mxu1 %v383_v16  ;;  %545 = vmatprep.mubr.f32.mxu1 %v385_v17 }
  0xe9   : > { %546 = vmatmul.mubr.f32.vlgmr.msra.gmra.mxu1 %v383_v16 }
 0x1a5   : > { %v466_v29 = vpop.f32.mrf.mxu1 }
 0x1a6   : > { %v470_v30 = vadd.f32 %v466_v29, %v399_v28 }
 0x1a7   : > { %v468_v31 = vpop.f32.mrf.mxu1 }
 0x1a8   : > { %472 = vst.msk [vmem:[%s853_s16] sm:$0xff] %vm276_vm1, %v470_v30 }
 0x1a9   : > { %v547_v33 = vpop.f32.mrf.mxu1 }
 0x1aa   : > { %v551_v34 = vadd.f32 %v547_v33, %v480_v32 }
 0x1ab   : > { %v549_v35 = vpop.f32.mrf.mxu1 }
 0x1ac   : > { %552 = vst.msk [vmem:[%s271_s22] sm:$0xff] %vm276_vm1, %v551_v34 }
 0x1af   : > { %v556_v36 = vld [vmem:[%s853_s16] sm:$0xff] }
 0x1b0   : > { %v557_v37 = vsel %vm276_vm1, %v556_v36, -inf }
 0x1b1   : > { %558 = vmax.xlane.f32.xlu1 %v557_v37 }
 0x23a   : > { %v559_v38 = vpop.xlane.xlu1 %558 }
 0x23b   : > { %v560_v39 = vsub.f32 %v556_v36, %v559_v38 }
 0x23d   : > { %v561_v40 = vmul.f32 1.442695, %v560_v39 }
 0x23f   : > { %745 = vpow2.f32 %v561_v40 }
 0x24c   : > { %v746_v41 = vpop.eup %745 }
 0x24d   : > { %v563_v42 = vsel %vm276_vm1, %v746_v41, 0.0 }
 0x24e   : > { %564 = vadd.xlane.f32.xlu0 %v563_v42 }
 0x252   : > { %475 = vadd.xlane.f32.xlu0 %v474_v19 }
 0x2d7   : > { %v565_v43 = vpop.xlane.xlu0 %564 }
 0x2d8   : > { %747 = vrcp.f32 %v565_v43 }
 0x2db   : > { %v476_v45 = vpop.xlane.xlu0 %475 }
 0x2dc   : > { %v477_v46 = vadd.f32 %v476_v45, %v473_v44 }
 0x2de   : > { %479 = vst.msk [vmem:[%s267_s25] sm:$0xff] %vm278_vm2, %v477_v46 }
 0x2e5   : > { %v748_v47 = vpop.eup %747 }
 0x2e6   : > { %v567_v48 = vmul.f32 %v748_v47, %v565_v43 }
 0x2e8   : > { %v568_v49 = vsub.f32 2.0, %v567_v48 }
 0x2ea   : > { %v569_v50 = vmul.f32 %v748_v47, %v568_v49 }
 0x2ec   : > { %v570_v51 = vmul.f32 %v746_v41, %v569_v50 }
 0x2ee   : > { %571 = vst.msk [vmem:[%s853_s16] sm:$0xff] %vm276_vm1, %v570_v51 }
 0x2ef PF: > { %s16_s20 = sadd.s32 1, %s771_s20   ;;  %s893_s18 = smov %s767_s19 }
 0x2f0   : > { %p13_p5 = scmp.ge.s32.totalorder %s16_s20, 4   ;;  %s894_s19 = smov %s896_s21 }
 0x2f2   :  { %15 = sbr.rel (!%p13_p5) target bundleno = 2 (0x2), region = 94 }

// kernel: spatial_gcn.3
= control target key start
LH: loop header
LB: loop body
LE: loop exit
PB: predicated region body
PF: predicated region fallthrough
CT: control target
= control target key end

     0   :  { %s573_s12 = smov 0   ;;  %s575_s13 = smov 0   ;;  %s620_s0 = inlined_call_operand.vmem [shape: f32[2,16,256], index: 0, kind: input, shape index: {}]   ;;  %s621_s1 = inlined_call_operand.vmem [shape: f32[2,16,16], index: 1, kind: input, shape index: {}]   ;;  %s622_s2 = inlined_call_operand.vmem [shape: f32[2,16,1], index: 2, kind: input, shape index: {}]   ;;  %s623_s3 = inlined_call_operand.vmem [shape: f32[2,16,256], index: 3, kind: output, shape index: {}]  }
   0x1   :  { %s577_s14 = smov 0  }
   0x2 LB: > { %s25_s15 = sadd.s32 1, %s545_s13  ;;  %p479_p0 = scmp.ge.s32.totalorder %s549_s14, 1  ;;  %s549_s14 = sphi %s577_s14, %s13_s14   ;;  %s545_s13 = sphi %s575_s13, %s625_s13   ;;  %s541_s12 = sphi %s573_s12, %s624_s12  }
   0x3   : > { %p27_p1 = scmp.ge.s32.totalorder %s25_s15, 2  ;;  %p178_p2 = scmp.lt.s32.totalorder %s549_s14, 3 }
   0x5   : > { %s627_s15 = smov (%p27_p1, %s25_s15), 0  ;;  %p179_p3 = pnand %p479_p0, %p178_p2 }
   0x6   : > { %p221_p4 = scmp.lt.s32.totalorder (!%p179_p3), %s541_s12, 1 }
   0x7   : > { %182 = sbr.rel (%p179_p3) target bundleno = 222 (0xde), region = 32 }
   0xc   : > { %v551_v0 = vmov 0.0   ;;  %s629_s12 = smov (!%p221_p4, %s541_s12), 1  ;;  %v552_v1 = vmov 0   ;;  %vm268_vm0 = vcmask 130048  }
   0xd   : > { %339 = vmatprep.mubr.f32.mxu0 %v551_v0  ;;  %345 = vmatprep.mubr.f32.mxu1 %v551_v0  ;;  %s492_s16 = sshll.u32 %s629_s12, 5  ;;  %s493_s17 = sshll.u32 %s629_s12, 4 }
   0xe   : > { %526 = vset.pattern.permute.xlu0 %v552_v1  ;;  %s228_s20 = scalar_lea.vmem %s620_s0, %s492_s16  ;;  %s234_s23 = scalar_lea.vmem %s621_s1, %s493_s17 }
   0xf   : > { %v253_v2 = vld [vmem:[%s228_s20 + $0x18] sm:$0xff]  ;;  %v252_v3 = vld [vmem:[%s228_s20 + $0x10] sm:$0xff]  ;;  %v251_v4 = vld [vmem:[%s228_s20 + $0x8] sm:$0xff]  ;;  %s239_s26 = scalar_lea.vmem %s622_s2, %s493_s17  ;;  %s248_s29 = scalar_lea.vmem %s623_s3, %s492_s16 }
  0x10   : > { %303 = vmatprep.subr.mxu0 %v253_v2  ;;  %496 = vmatprep.subr.mxu1 %v253_v2  ;;  %v250_v5 = vld [vmem:[%s228_s20] sm:$0xff]  ;;  %v255_v7 = vld [vmem:[%s234_s23 + $0x8] sm:$0xff] }
  0x11   : > { %304 = vmatpush1.msra.mxu0 %v252_v3  ;;  %498 = vmatpush1.msra.mxu1 %v252_v3  ;;  %v254_v6 = vld [vmem:[%s234_s23] sm:$0xff]  ;;  %v257_v9 = vld [vmem:[%s239_s26 + $0x8] sm:$0xff] }
  0x12   : > { %305 = vmatprep.subr.mxu0 %v251_v4  ;;  %497 = vmatprep.subr.mxu1 %v251_v4  ;;  %v256_v8 = vld [vmem:[%s239_s26] sm:$0xff] }
  0x13   : > { %306 = vmatpush1.msra.mxu0 %v250_v5  ;;  %499 = vmatpush1.msra.mxu1 %v250_v5 }
  0x14   : > { %488 = vmatmul.mubr.msk.f32.vlgmr.msra.gmra.mxu0 %vm268_vm0, %v254_v6  ;;  %489 = vmatmul.mubr.msk.f32.vlgmr.msra.gmra.mxu1 %vm268_vm0, %v255_v7 }
  0x15   : > { %260 = vperm.xlu0 %526, %v256_v8  }
  0x19   : > { %265 = vperm.xlu0 %526, %v257_v9  }
  0x90   : > { %v261_v10 = vpop.permute.xlu0 %260 }
  0x94   : > { %v266_v11 = vpop.permute.xlu0 %265 }
  0xd4   : > { %v341_v12 = vpop.f32.mrf.mxu0  ;;  %v347_v13 = vpop.f32.mrf.mxu1 }
  0xd5   : > { %v342_v14 = vadd.f32 %v341_v12, %v261_v10  ;;  %v348_v15 = vadd.f32 %v347_v13, %v266_v11 }
  0xd6   : > { %v343_v16 = vpop.f32.mrf.mxu0  ;;  %v349_v17 = vpop.f32.mrf.mxu1 }
  0xd7   : > { %v352_v18 = vadd.f32 %v342_v14, %v250_v5  ;;  %v354_v19 = vadd.f32 %v348_v15, %v252_v3  ;;  %v344_v20 = vadd.f32 %v343_v16, %v261_v10  ;;  %v350_v21 = vadd.f32 %v349_v17, %v266_v11 }
  0xd9   : > { %v356_v22 = vmax.f32 %v352_v18, 0.0  ;;  %v358_v23 = vmax.f32 %v354_v19, 0.0  ;;  %v353_v24 = vadd.f32 %v344_v20, %v251_v4  ;;  %v355_v25 = vadd.f32 %v350_v21, %v253_v2 }
  0xdb   : > { %360 = vst [vmem:[%s248_s29] sm:$0xff] %v356_v22  ;;  %362 = vst [vmem:[%s248_s29 + $0x10] sm:$0xff] %v358_v23  ;;  %v357_v26 = vmax.f32 %v353_v24, 0.0  ;;  %v359_v27 = vmax.f32 %v355_v25, 0.0 }
  0xdd   : > { %361 = vst [vmem:[%s248_s29 + $0x8] sm:$0xff] %v357_v26  ;;  %363 = vst [vmem:[%s248_s29 + $0x18] sm:$0xff] %v359_v27 }
  0xde PF: > { %s13_s14 = sadd.s32 1, %s549_s14   ;;  %s624_s12 = smov %s545_s13 }
  0xdf   : > { %p10_p5 = scmp.ge.s32.totalorder %s13_s14, 4   ;;  %s625_s13 = smov %s627_s15 }
  0xe1   :  { %12 = sbr.rel (!%p10_p5) target bundleno = 2 (0x2), region = 68 }

</bundles_post_ra>
